<compile_context>
chip_gen: v7x
topology: tpu7x:2x2x1
jax: 0.10.0
libtpu: 0.0.40
codegen_flags: <defaults>
</compile_context>

<pallas_src>
import jax
import jax.numpy as jnp
from jax.experimental import pallas as pl
from jax.experimental.pallas import tpu as pltpu


# ---------------------------------------------------------------------------
# Kernel
# ---------------------------------------------------------------------------
def _im2seq_kernel(x_ref, o_ref):
    # x_ref block: (TB, C, TW)  ->  o_ref block: (TB, TW, C).
    # Each per-batch (C, TW) -> (TW, C) transpose lowers to the XLU transpose
    # unit; TB is a small static constant so the Python loop fully unrolls.
    for b in range(x_ref.shape[0]):
        o_ref[b, :, :] = x_ref[b, :, :].T


# ---------------------------------------------------------------------------
# Tile selection (padding-aware)
# ---------------------------------------------------------------------------
_LANE = 128
_MAX_TB = 32                              # bound on per-step batch unroll
_DEFAULT_BLOCK_TARGET = 2 * 1024 * 1024   # ~1-2 MiB of padded block per buffer


def _round_up(x: int, m: int) -> int:
    return ((x + m - 1) // m) * m


def _min_sublane(itemsize: int) -> int:
    # Minimum sublane tile: 8 (f32), 16 (bf16), 32 (int8/fp8) — sub-32-bit
    # dtypes pack along sublanes.
    return max(8, 32 // itemsize)


def _padded_block_bytes(tb: int, c: int, tw: int, itemsize: int):
    """VMEM bytes of one input block (tb, C, tw) and one output block
    (tb, tw, C), accounting for (sublane, lane) layout padding."""
    sub = _min_sublane(itemsize)
    in_bytes = tb * _round_up(c, sub) * _round_up(tw, _LANE) * itemsize
    out_bytes = tb * _round_up(tw, sub) * _round_up(c, _LANE) * itemsize
    return in_bytes, out_bytes


def _vmem_budget_bytes() -> int:
    """Budget for total resident blocks (2x in + 2x out, double-buffered)."""
    phys = 64 * 1024 * 1024          # most conservative default: v7x physical
    try:
        info = pltpu.get_tpu_info()
        phys = int(getattr(info, "vmem_capacity_bytes", phys)) or phys
    except Exception:
        pass
    # Stay in the ~16-24 MiB resident range: survives the scoped-VMEM defaults
    # (16 MiB v5e, 32 MiB v6e/v7x) and leaves ample headroom on v7x's 64 MiB.
    return min(phys // 3, 24 * 1024 * 1024)


def _choose_tiles(B, C, W, itemsize, target_block_bytes):
    budget = _vmem_budget_bytes()
    target = max(64 * 1024, min(target_block_bytes, budget // 4))

    sub = _min_sublane(itemsize)
    # Padded bytes contributed by one 128-lane chunk of W, per batch element.
    unit_in = _round_up(C, sub) * _LANE * itemsize
    unit_out = _LANE * _round_up(C, _LANE) * itemsize   # output lane-pads C->128
    unit = max(unit_in, unit_out)

    if unit * pl.cdiv(W, _LANE) <= target:
        # A full-W tile fits the per-buffer target; batch several batch
        # elements per grid step to amortize the ~0.35 us step overhead.
        tw = W
        in1, out1 = _padded_block_bytes(1, C, W, itemsize)
        tb = max(1, target // max(in1, out1))
        tb = min(tb, B, _MAX_TB)
    else:
        # Tile W in lane-aligned chunks sized to ~target padded bytes/buffer.
        # TODO(synk): also tile C (in multiples of 128) for extremely large C.
        tw = max(_LANE, (target // unit) * _LANE)
        if tw >= W:
            tw = W
        tb = 1

    # Guarantee >= 2 total grid steps when the shape allows it so both v7x
    # TensorCores get work (both axes are "parallel"); elsewhere this only
    # costs one extra grid step.
    if pl.cdiv(B, tb) * pl.cdiv(W, tw) == 1:
        if B > 1:
            tb = pl.cdiv(B, 2)
        elif W > 2 * _LANE:
            tw = _round_up(pl.cdiv(W, 2), _LANE)

    return int(tb), int(tw)


# ---------------------------------------------------------------------------
# Wrapper
# ---------------------------------------------------------------------------
def im2seq(x: jax.Array,
           *,
           block_target_bytes: int = _DEFAULT_BLOCK_TARGET,
           _tile_b: int | None = None,
           _tile_w: int | None = None) -> jax.Array:
    """Pallas implementation of Im2Seq.forward.

    Args:
      x: (B, C, 1, W) array (NCHW with H == 1).
      block_target_bytes: approximate padded VMEM bytes per pipeline buffer.
      _tile_b/_tile_w: test-only overrides of the chosen tile sizes
        (_tile_w must be a multiple of 128 or equal to W).
    Returns:
      (B, W, C) array, same dtype as x.
    """
    B, C, H, W = x.shape
    assert H == 1, "Im2Seq requires H == 1"

    # Free metadata-only squeeze of the H axis: (B, C, 1, W) -> (B, C, W).
    x3 = jnp.reshape(x, (B, C, W))

    itemsize = jnp.dtype(x.dtype).itemsize
    tb, tw = _choose_tiles(B, C, W, itemsize, block_target_bytes)
    if _tile_b is not None:
        tb = int(_tile_b)
    if _tile_w is not None:
        tw = int(_tile_w)

    b_tiles = pl.cdiv(B, tb)
    w_tiles = pl.cdiv(W, tw)

    # Explicit scoped-VMEM limit: padded, double-buffered in+out blocks plus
    # 2x headroom, clamped under v7x's 64 MiB physical ceiling.
    in_b, out_b = _padded_block_bytes(tb, C, tw, itemsize)
    resident = 2 * (in_b + out_b)
    vmem_limit = int(min(max(2 * resident, 16 * 1024 * 1024),
                         64 * 1024 * 1024))

    cost = pl.CostEstimate(
        flops=0,
        transcendentals=0,
        bytes_accessed=2 * B * C * W * itemsize,
    )

    return pl.pallas_call(
        _im2seq_kernel,
        out_shape=jax.ShapeDtypeStruct((B, W, C), x.dtype),
        grid_spec=pltpu.PrefetchScalarGridSpec(
            num_scalar_prefetch=0,
            grid=(b_tiles, w_tiles),
            in_specs=[
                # (C, TW): sublane-dense rows, lane-dense columns.
                pl.BlockSpec((tb, C, tw), lambda b, w: (b, 0, w)),
            ],
            # (TW, C): TW is a multiple of 128 (or full W), C is the full dim.
            out_specs=pl.BlockSpec((tb, tw, C), lambda b, w: (b, w, 0)),
        ),
        compiler_params=pltpu.CompilerParams(
            dimension_semantics=("parallel", "parallel"),
            vmem_limit_bytes=vmem_limit,
        ),
        cost_estimate=cost,
    )(x3)


if __name__ == "__main__":
    def ref_im2seq(v):
        return jnp.transpose(jnp.squeeze(v, axis=2), (0, 2, 1))

    # 1) Small shape consistent with the module (H must be 1): default tiling
    #    (full-W blocks, batch-tiled grid of >= 2 steps).
    key = jax.random.PRNGKey(0)
    B, C, H, W = 2, 4, 1, 16
    x = jax.random.normal(key, (B, C, H, W), dtype=jnp.float32)
    out = jax.block_until_ready(im2seq(x))
    assert out.shape == (B, W, C), out.shape
    assert out.dtype == x.dtype
    assert jnp.array_equal(out, ref_im2seq(x)), "mismatch vs reference (default)"

    # 2) Multi-tile grid with ragged last tiles on BOTH axes
    #    (W = 300 -> 128 + 128 + 44 and B = 3 -> 2 + 1), validating the
    #    partial-block masked writeback path the review flagged as untested.
    key2 = jax.random.PRNGKey(1)
    x2 = jax.random.normal(key2, (3, 8, 1, 300), dtype=jnp.float32)
    out2 = jax.block_until_ready(im2seq(x2, _tile_b=2, _tile_w=128))
    assert out2.shape == (3, 300, 8), out2.shape
    assert jnp.array_equal(out2, ref_im2seq(x2)), "mismatch vs reference (ragged)"

    print("KERNEL_OK")
</pallas_src>

<mosaic_0001>
module attributes {stable_mosaic.version = 11 : i64} {
  func.func @_im2seq_kernel(%arg0: i32, %arg1: i32, %arg2: memref<1x4x16xf32, #tpu.memory_space<vmem>>, %arg3: memref<1x16x4xf32, #tpu.memory_space<vmem>>) attributes {dimension_semantics = [#tpu.dimension_semantics<parallel>, #tpu.dimension_semantics<parallel>], iteration_bounds = array<i64: 2, 1>, scalar_prefetch = 0 : i64, scratch_operands = 0 : i64, tpu.core_type = #tpu.core_type<tc>, window_params = [{transform_indices = @transform_0, window_bounds = array<i64: 1, 4, 16>}, {transform_indices = @transform_1, window_bounds = array<i64: 1, 16, 4>}]} {
    %c0 = arith.constant 0 : index
    %c0_0 = arith.constant 0 : index
    %c0_1 = arith.constant 0 : index
    %0 = vector.load %arg2[%c0, %c0_0, %c0_1] : memref<1x4x16xf32, #tpu.memory_space<vmem>>, vector<1x4x16xf32>
    %1 = vector.shape_cast %0 : vector<1x4x16xf32> to vector<4x16xf32>
    %2 = tpu.transpose %1, [1, 0] : vector<4x16xf32> -> vector<16x4xf32>
    %c0_2 = arith.constant 0 : index
    %c0_3 = arith.constant 0 : index
    %c0_4 = arith.constant 0 : index
    %3 = vector.load %arg3[%c0_2, %c0_3, %c0_4] : memref<1x16x4xf32, #tpu.memory_space<vmem>>, vector<1x16x4xf32>
    %4 = vector.shape_cast %3 : vector<1x16x4xf32> to vector<16x4xf32>
    %5 = vector.shape_cast %2 : vector<16x4xf32> to vector<1x16x4xf32>
    tpu.vector_store %arg3[%c0_2, %c0_3, %c0_4], %5 {strides = array<i32>} : memref<1x16x4xf32, #tpu.memory_space<vmem>>, vector<1x16x4xf32>,
    return
  }
  func.func @transform_0(%arg0: i32, %arg1: i32) -> (i32, i32, i32) {
    %c0_i32 = arith.constant 0 : i32
    %c0_i32_0 = arith.constant 0 : i32
    return %arg0, %c0_i32, %arg1 : i32, i32, i32
  }
  func.func @transform_1(%arg0: i32, %arg1: i32) -> (i32, i32, i32) {
    %c0_i32 = arith.constant 0 : i32
    %c0_i32_0 = arith.constant 0 : i32
    return %arg0, %arg1, %c0_i32 : i32, i32, i32
  }
}

</mosaic_0001>

<bundles_post_ra>
// kernel: tpu_custom_call.1
= control target key start
LH: loop header
LB: loop body
LE: loop exit
PB: predicated region body
PF: predicated region fallthrough
CT: control target
= control target key end

     0   :  { %6 = vsyncpa [#allocation3], 0  ;;  %s576_s0 = inlined_call_operand.hbm [shape: f32[2,4,16], index: 0, kind: input, shape index: {}]   ;;  %s577_s1 = inlined_call_operand.vmem [shape: f32[2,16,4], index: 1, kind: output, shape index: {}]  }
   0x1   :  { %8 = vsyncpa [#allocation3 + $0x1], 0  ;;  %s451_s6 = smov 0   ;;  %s453_s7 = smov 0  }
   0x2   :  { %s455_s8 = smov 0   ;;  %s457_s9 = smov 0  }
   0x3   :  { %s459_s10 = smov 0   ;;  %s461_s11 = smov 0  }
   0x4 LB: > { %s289_s12 = sadd.s32 4294967295, %s438_s11   ;;  %s26_s13 = sadd.s32 1, %s434_s10  ;;  %s438_s11 = sphi %s461_s11, %s14_s11   ;;  %s434_s10 = sphi %s459_s10, %s587_s10   ;;  %s430_s9 = sphi %s457_s9, %s586_s9   ;;  %s426_s8 = sphi %s455_s8, %s585_s8   ;;  %s422_s7 = sphi %s453_s7, %s584_s7   ;;  %s418_s6 = sphi %s451_s6, %s583_s6  }
   0x5   : > { %p28_p0 = scmp.ge.s32.totalorder %s26_s13, 2  ;;  %s35_s14 = sadd.s32 1, %s426_s8 }
   0x6   : > { %p42_p1 = scmp.ne.s32.totalorder %s426_s8, %s422_s7  ;;  %p43_p2 = scmp.eq.s32.totalorder %s438_s11, 0 }
   0x7   : > { %s589_s13 = smov (%p28_p0, %s26_s13), 0  ;;  %p48_p4 = scmp.ne.s32.totalorder %s422_s7, %s418_s6 }
   0x8   : > { %p487_p3 = por %p43_p2, %p42_p1  ;;  %s30_s16 = ssub.s32 %s434_s10, %s589_s13 }
   0x9   : > { %p49_p5 = scmp.eq.s32.totalorder %s289_s12, 0  ;;  %p33_p6 = scmp.eq.s32.totalorder %s30_s16, 0 }
   0xa   : > { %p308_p8 = scmp.lt.s32.totalorder %s438_s11, 2  ;;  %s100_s19 = sand.u32 1, %s426_s8  }
   0xb   : > { %p494_p7 = por %p49_p5, %p48_p4  ;;  %s294_s20 = sshll.u32 %s434_s10, 6 }
   0xc   : > { %s500_s18 = scalar_select %p33_p6, %s426_s8, %s35_s14  }
   0xd   : > { %s293_s21 = sshll.u32 %s100_s19, 2  ;;  %s507_s24 = scalar_lea.hbm %s576_s0, %s294_s20 }
   0xe   : > { %s104_s25 = scalar_lea.vmem [#allocation2], %s293_s21  ;;  %p511_p9 = pnand %p308_p8, %p487_p3 }
   0xf   : > { %s112_s26 = sshll.u32 %s104_s25, 4  ;;  %s101_s28 = scalar_lea.sflag [#allocation3], %s100_s19  ;;  %s515_s26 = int_to_ptr.vmem [resolvable:$true] %s112_s26 }
  0x10   : > { %s358_s29 = scalar_lea.hbm %s507_s24, 64  ;;  %p360_p13 = pneg %p511_p9 }
  0x11   : > { %p359_p12 = scmp.ne.s32.totalorder %s507_s24, %s358_s29  ;;  %s363_s3 = scalar_lea.hbm %s576_s0, 128 }
  0x12   : > { %p364_p2 = scmp.lt.u32.totalorder %s507_s24, %s576_s0  ;;  %p365_p3 = scmp.lt.u32.totalorder %s363_s3, %s358_s29 }
  0x13   : > { %p361_p0 = pnand %p360_p13, %p359_p12  ;;  %p367_p5 = scmp.lt.u32.totalorder %s358_s29, %s507_s24 }
  0x14   : > { %p366_p4 = por %p365_p3, %p364_p2 }
  0x15   : > { %p362_p1 = pneg %p361_p0 }
  0x16   : > { %p368_p6 = por %p367_p5, %p366_p4 }
  0x18   : > { %p369_p8 = pnand %p368_p6, %p362_p1 }
  0x1a   : > { %372 = shalt.err (!%p369_p8)
}
  0x1b   : > { %s373_s6 = scalar_lea.vmem %s515_s26, 64  ;;  %s440_s12 = smov [#allocation2]  }
  0x1c   : > { %p374_p12 = scmp.ne.s32.totalorder %s515_s26, %s373_s6  ;;  %s378_s14 = sshll.u32 %s440_s12, 4  ;;  %s379_s14 = int_to_ptr.vmem [resolvable:$false] %s378_s14 }
  0x1d   : > { %s380_s15 = scalar_lea.vmem %s379_s14, 128  ;;  %p381_p11 = scmp.lt.s32.totalorder %s515_s26, %s379_s14 }
  0x1e   : > { %p376_p0 = pnand %p374_p12, %p360_p13  ;;  %p382_p2 = scmp.lt.s32.totalorder %s380_s15, %s373_s6 }
  0x20   : > { %p377_p10 = pneg %p376_p0  ;;  %p383_p3 = por %p382_p2, %p381_p11 }
  0x22   : > { %p384_p4 = pnand %p383_p3, %p377_p10 }
  0x24   : > { %387 = shalt.err (!%p384_p4)
}
  0x25   : > { %307 = dma.hbm_to_vmem [thread:$0]  (!%p511_p9), %s507_s24, 64, %s515_s26, %s101_s28  }
  0x26   : > { %p581_p1 = scmp.lt.s32.totalorder %s438_s11, 3  ;;  %p582_p5 = scmp.ge.s32.totalorder %s438_s11, 1 }
  0x28   : > { %p118_p13 = pnand %p582_p5, %p581_p1 }
  0x29   : > { %s123_s16 = sand.u32 (!%p118_p13), 1, %s422_s7  }
  0x2a   : > { %121 = sbr.rel (%p118_p13) target bundleno = 185 (0xb9), region = 24  ;;  %s296_s19 = sshll.u32 (!%p118_p13), %s123_s16, 2 }
  0x2b   : > { %s124_s20 = scalar_lea.sflag (!%p118_p13), [#allocation3], %s123_s16  ;;  %s127_s21 = scalar_lea.vmem (!%p118_p13), [#allocation2], %s296_s19 }
  0x31   : > { %413 = dma.done.wait (%p494_p7), %s124_s20, 64  }
  0x32   : > { %415 = vsyncadd (%p494_p7), %s124_s20, 4294967232  ;;  %v160_v0 = vld [vmem:[%s127_s21] sm:$0xf]  ;;  %p151_p9 = scmp.lt.s32.totalorder %s430_s9, 1  ;;  %vm193_vm0 = vcmask 31744  }
  0x33   : > { %161 = vxpose.xlu0.b32.start.end [1/1] (short) (narrow) %v160_v0, 16 }
  0x34   : > { %s591_s9 = smov (!%p151_p9, %s430_s9), 1 }
  0x35   : > { %s301_s22 = sshll.u32 %s591_s9, 4 }
  0x36   : > { %s158_s25 = scalar_lea.vmem %s577_s1, %s301_s22 }
  0xb3   : > { %v177_v1 = vpop.trf.xlu0 }
  0xb4   : > { %194 = vst.msk [vmem:[%s158_s25] sm:$0xff] %vm193_vm0, %v177_v1 }
  0xb7   : > { %v178_v2 = vpop.trf.xlu0 }
  0xb8   : > { %195 = vst.msk [vmem:[%s158_s25 + $0x8] sm:$0xff] %vm193_vm0, %v178_v2 }
  0xb9 PF: > { %s14_s11 = sadd.s32 1, %s438_s11   ;;  %s583_s6 = smov %s422_s7 }
  0xba   : > { %p11_p7 = scmp.ge.s32.totalorder %s14_s11, 4   ;;  %s584_s7 = smov %s426_s8 }
  0xbb   : > { %s585_s8 = smov %s500_s18  ;;  %s586_s9 = smov %s434_s10 }
  0xbc   : > { %s587_s10 = smov %s589_s13  ;;  %13 = sbr.rel (!%p11_p7) target bundleno = 4 (0x4), region = 64 }
  0xc3   :  { %226 = vsyncpa [#allocation3], 1 }
  0xc4   :  { %228 = vsyncpa [#allocation3 + $0x1], 1 }

</bundles_post_ra>
